<compile_context>
chip_gen: v6e
topology: v6e:2x2x1
jax: 0.10.0
libtpu: 0.0.40
codegen_flags: <defaults>
</compile_context>

<pallas_src>
import jax
import jax.numpy as jnp
from jax.experimental import pallas as pl
from jax.experimental.pallas import tpu as pltpu

IMG_SHAPE = (1, 28, 28)
IMG_SIZE = 28 * 28            # 784
IMG_SIZE_PAD = 896            # next multiple of 128 (lane-dense, unmasked vst)
LATENT_DIM = 100
LATENT_DIM_PAD = 128          # next multiple of 128
H1, H2, H3 = 128, 256, 512
BN_EPS = 1e-5
LRELU_SLOPE = 0.2


def _leaky_relu(x):
    # slope < 1  =>  leaky_relu(x) == max(x, slope * x)
    return jnp.maximum(x, LRELU_SLOPE * x)


# --------------------------------------------------------------------------
# Stage kernels (each runs over a grid of batch tiles)
# --------------------------------------------------------------------------
def _stage1_kernel(z_ref, w1_ref, b1_ref, w2_ref, h2_ref, s_ref, sq_ref):
    # Linear(100->128) + LeakyReLU, then Linear(128->256) *without* bias
    # (b2 is cancelled by the following training-mode BatchNorm).
    z = z_ref[...]                                                   # (TB,128) bf16
    h1 = jnp.dot(z, w1_ref[...], preferred_element_type=jnp.float32) + b1_ref[...]
    h1 = _leaky_relu(h1)
    h2 = jnp.dot(h1.astype(jnp.bfloat16), w2_ref[...],
                 preferred_element_type=jnp.float32)                 # (TB,256) f32
    h2_bf = h2.astype(jnp.bfloat16)
    h2_ref[...] = h2_bf                                              # bf16 HBM intermediate
    # per-tile partial BN statistics of the values actually stored
    h2f = h2_bf.astype(jnp.float32)
    s_ref[...] = jnp.sum(h2f, axis=0, keepdims=True).reshape(1, 1, H2)
    sq_ref[...] = jnp.sum(h2f * h2f, axis=0, keepdims=True).reshape(1, 1, H2)


def _stage2_kernel(h2_ref, sc_ref, sh_ref, w3_ref, h3_ref, s_ref, sq_ref):
    # BN(256) folded to scale/shift + LeakyReLU, Linear(256->512) without bias.
    h2 = h2_ref[...].astype(jnp.float32)                             # (TB,256)
    a2 = _leaky_relu(h2 * sc_ref[...] + sh_ref[...])
    h3 = jnp.dot(a2.astype(jnp.bfloat16), w3_ref[...],
                 preferred_element_type=jnp.float32)                 # (TB,512) f32
    h3_bf = h3.astype(jnp.bfloat16)
    h3_ref[...] = h3_bf
    h3f = h3_bf.astype(jnp.float32)
    s_ref[...] = jnp.sum(h3f, axis=0, keepdims=True).reshape(1, 1, H3)
    sq_ref[...] = jnp.sum(h3f * h3f, axis=0, keepdims=True).reshape(1, 1, H3)


def _stage3_kernel(h3_ref, sc_ref, sh_ref, w4_ref, b4_ref, out_ref):
    # BN(512) folded + LeakyReLU, Linear(512->896[pad]) + bias + Tanh.
    h3 = h3_ref[...].astype(jnp.float32)                             # (TB,512)
    a3 = _leaky_relu(h3 * sc_ref[...] + sh_ref[...])
    h4 = jnp.dot(a3.astype(jnp.bfloat16), w4_ref[...],
                 preferred_element_type=jnp.float32) + b4_ref[...]
    out_ref[...] = jnp.tanh(h4).astype(out_ref.dtype)


# --------------------------------------------------------------------------
# Parameters
# --------------------------------------------------------------------------
def init_params(key):
    """PyTorch nn.Linear-style uniform init, lane padding baked in, bf16 weights.
    b2/b3 are intentionally omitted: added before training-mode BatchNorm they
    are cancelled by the mean subtraction."""
    dims = {1: (LATENT_DIM, H1), 2: (H1, H2), 3: (H2, H3), 4: (H3, IMG_SIZE)}
    params = {}
    keys = jax.random.split(key, 8)
    for layer, (fan_in, fan_out) in dims.items():
        bound = 1.0 / float(fan_in) ** 0.5
        w = jax.random.uniform(keys[2 * (layer - 1)], (fan_in, fan_out),
                               jnp.float32, -bound, bound)
        b = jax.random.uniform(keys[2 * (layer - 1) + 1], (1, fan_out),
                               jnp.float32, -bound, bound)
        if layer == 1:                       # latent rows 100 -> 128 (zero pad)
            w = jnp.pad(w, ((0, LATENT_DIM_PAD - LATENT_DIM), (0, 0)))
        if layer == 4:                       # output cols 784 -> 896 (zero pad)
            w = jnp.pad(w, ((0, 0), (0, IMG_SIZE_PAD - IMG_SIZE)))
            b = jnp.pad(b, ((0, 0), (0, IMG_SIZE_PAD - IMG_SIZE)))
        params[f"w{layer}"] = w.astype(jnp.bfloat16)   # MXU operand: bf16
        if layer in (1, 4):
            params[f"b{layer}"] = b                    # f32 epilogue bias
    # BatchNorm affine params at PyTorch init: gamma=1, beta=0 (f32)
    params["g2"] = jnp.ones((1, H2), jnp.float32)
    params["be2"] = jnp.zeros((1, H2), jnp.float32)
    params["g3"] = jnp.ones((1, H3), jnp.float32)
    params["be3"] = jnp.zeros((1, H3), jnp.float32)
    return params


# --------------------------------------------------------------------------
# Helpers
# --------------------------------------------------------------------------
def _bn_fold(part_sum, part_sumsq, count, gamma, beta):
    """Reduce per-tile partial sums -> whole-batch scale/shift (tiny (1,N) ops)."""
    s = jnp.sum(part_sum, axis=0)        # (1, N)
    sq = jnp.sum(part_sumsq, axis=0)     # (1, N)
    mean = s / count
    var = jnp.maximum(sq / count - mean * mean, 0.0)   # biased (training-mode BN)
    scale = gamma * jax.lax.rsqrt(var + BN_EPS)
    shift = beta - mean * scale
    return scale, shift


def _pick_batch_tile(batch):
    # Prefer 512/256 (fills v6e/v7x 256-wide MXU rows); all candidates are
    # multiples of 16 (bf16 sublane packing).  Fall back to a single
    # full-extent block for small/ragged batches.
    for tb in (512, 256, 128, 64, 32, 16):
        if batch % tb == 0:
            return tb
    return batch


def _vmem_limit_bytes(tb, out_itemsize):
    # resident bf16 weights (worst case the whole set), double-buffered in/out
    # tiles of the heaviest stage (stage 3) and its f32 intermediates.
    weights = 2 * (LATENT_DIM_PAD * H1 + H1 * H2 + H2 * H3 + H3 * IMG_SIZE_PAD)
    tiles = 2 * tb * H3 * 2 + 2 * tb * IMG_SIZE_PAD * out_itemsize
    interm = 4 * tb * (H3 + IMG_SIZE_PAD)
    need = weights + tiles + interm + (8 << 20)          # generous slack
    try:                                                  # generation-aware cap
        cap = pltpu.get_tpu_info().vmem_capacity_bytes - (8 << 20)
    except Exception:
        cap = 56 << 20                                    # v7x: 64 MiB physical
    return int(min(max(need, 32 << 20), cap))


# --------------------------------------------------------------------------
# Forward pass
# --------------------------------------------------------------------------
def generator_forward(z, params, *, out_dtype=jnp.float32, padded_output=False):
    B = z.shape[0]
    tb = _pick_batch_tile(B)
    nt = B // tb
    assert nt * tb == B

    # zero-pad latent 100 -> 128, cast matmul operand to bf16
    z_p = jnp.pad(z.astype(jnp.float32),
                  ((0, 0), (0, LATENT_DIM_PAD - LATENT_DIM))).astype(jnp.bfloat16)

    cparams = pltpu.CompilerParams(
        dimension_semantics=("parallel",),      # v7x: shard batch tiles over both TCs
        vmem_limit_bytes=_vmem_limit_bytes(tb, jnp.dtype(out_dtype).itemsize))

    row = lambda i: (i, 0)        # batch-tiled arrays
    row3 = lambda i: (i, 0, 0)    # per-tile stats
    const = lambda i: (0, 0)      # weights / biases / scale / shift stay resident

    # ---- stage 1: Linear+LReLU, Linear (no bias), partial stats of h2 --------
    h2_raw, s1, sq1 = pl.pallas_call(
        _stage1_kernel,
        grid=(nt,),
        in_specs=[
            pl.BlockSpec((tb, LATENT_DIM_PAD), row),
            pl.BlockSpec((LATENT_DIM_PAD, H1), const),
            pl.BlockSpec((1, H1), const),
            pl.BlockSpec((H1, H2), const),
        ],
        out_specs=[
            pl.BlockSpec((tb, H2), row),
            pl.BlockSpec((1, 1, H2), row3),
            pl.BlockSpec((1, 1, H2), row3),
        ],
        out_shape=[
            jax.ShapeDtypeStruct((B, H2), jnp.bfloat16),
            jax.ShapeDtypeStruct((nt, 1, H2), jnp.float32),
            jax.ShapeDtypeStruct((nt, 1, H2), jnp.float32),
        ],
        compiler_params=cparams,
    )(z_p, params["w1"], params["b1"], params["w2"])

    sc2, sh2 = _bn_fold(s1, sq1, B, params["g2"], params["be2"])

    # ---- stage 2: BN(256)+LReLU, Linear (no bias), partial stats of h3 -------
    h3_raw, s2, sq2 = pl.pallas_call(
        _stage2_kernel,
        grid=(nt,),
        in_specs=[
            pl.BlockSpec((tb, H2), row),
            pl.BlockSpec((1, H2), const),
            pl.BlockSpec((1, H2), const),
            pl.BlockSpec((H2, H3), const),
        ],
        out_specs=[
            pl.BlockSpec((tb, H3), row),
            pl.BlockSpec((1, 1, H3), row3),
            pl.BlockSpec((1, 1, H3), row3),
        ],
        out_shape=[
            jax.ShapeDtypeStruct((B, H3), jnp.bfloat16),
            jax.ShapeDtypeStruct((nt, 1, H3), jnp.float32),
            jax.ShapeDtypeStruct((nt, 1, H3), jnp.float32),
        ],
        compiler_params=cparams,
    )(h2_raw, sc2, sh2, params["w3"])

    sc3, sh3 = _bn_fold(s2, sq2, B, params["g3"], params["be3"])

    # ---- stage 3: BN(512)+LReLU, Linear+bias, Tanh ----------------------------
    flat = pl.pallas_call(
        _stage3_kernel,
        grid=(nt,),
        in_specs=[
            pl.BlockSpec((tb, H3), row),
            pl.BlockSpec((1, H3), const),
            pl.BlockSpec((1, H3), const),
            pl.BlockSpec((H3, IMG_SIZE_PAD), const),
            pl.BlockSpec((1, IMG_SIZE_PAD), const),
        ],
        out_specs=pl.BlockSpec((tb, IMG_SIZE_PAD), row),
        out_shape=jax.ShapeDtypeStruct((B, IMG_SIZE_PAD), out_dtype),
        compiler_params=cparams,
    )(h3_raw, sc3, sh3, params["w4"], params["b4"])

    if padded_output:
        # lane-dense (B, 896) slab for a fused downstream consumer; avoids the
        # extra HBM read/write of the crop copy.
        return flat
    # img = img.view(img.size(0), 1, 28, 28)
    return flat[:, :IMG_SIZE].reshape(B, *IMG_SHAPE)


# --------------------------------------------------------------------------
# Pure-JAX f32 reference (PyTorch semantics) for a loose correctness check
# --------------------------------------------------------------------------
def generator_reference(z, params):
    def bn(x, g, b):
        m = jnp.mean(x, axis=0, keepdims=True)
        v = jnp.mean((x - m) ** 2, axis=0, keepdims=True)
        return (x - m) * jax.lax.rsqrt(v + BN_EPS) * g + b

    z_p = jnp.pad(z, ((0, 0), (0, LATENT_DIM_PAD - LATENT_DIM)))
    w1 = params["w1"].astype(jnp.float32)
    w2 = params["w2"].astype(jnp.float32)
    w3 = params["w3"].astype(jnp.float32)
    w4 = params["w4"].astype(jnp.float32)
    h1 = _leaky_relu(z_p @ w1 + params["b1"])
    h2 = _leaky_relu(bn(h1 @ w2, params["g2"], params["be2"]))
    h3 = _leaky_relu(bn(h2 @ w3, params["g3"], params["be3"]))
    h4 = jnp.tanh(h3 @ w4 + params["b4"])
    return h4[:, :IMG_SIZE].reshape(z.shape[0], *IMG_SHAPE)


if __name__ == "__main__":
    key = jax.random.PRNGKey(0)
    pkey, zkey = jax.random.split(key)
    params = init_params(pkey)

    B = 16  # batch > 1 required for training-mode BatchNorm semantics
    z = jax.random.normal(zkey, (B, LATENT_DIM), jnp.float32)

    img = generator_forward(z, params)
    jax.block_until_ready(img)

    assert img.shape == (B, *IMG_SHAPE)
    assert bool(jnp.all(jnp.isfinite(img)))
    assert bool(jnp.all(jnp.abs(img) <= 1.0 + 1e-6))        # tanh range
    ref = generator_reference(z, params)
    # loose tolerance: kernel uses bf16 MXU operands / bf16 intermediates
    assert float(jnp.max(jnp.abs(img - ref))) < 0.25
    print("KERNEL_OK")
</pallas_src>

<mosaic_0001>
module attributes {stable_mosaic.version = 11 : i64} {
  func.func @_stage1_kernel(%arg0: i32, %arg1: memref<16x128xbf16, #tpu.memory_space<vmem>>, %arg2: memref<128x128xbf16, #tpu.memory_space<vmem>>, %arg3: memref<1x128xf32, #tpu.memory_space<vmem>>, %arg4: memref<128x256xbf16, #tpu.memory_space<vmem>>, %arg5: memref<16x256xbf16, #tpu.memory_space<vmem>>, %arg6: memref<1x1x256xf32, #tpu.memory_space<vmem>>, %arg7: memref<1x1x256xf32, #tpu.memory_space<vmem>>) attributes {dimension_semantics = [#tpu.dimension_semantics<parallel>], iteration_bounds = array<i64: 1>, scalar_prefetch = 0 : i64, scratch_operands = 0 : i64, tpu.core_type = #tpu.core_type<tc>, window_params = [{transform_indices = @transform_0, window_bounds = array<i64: 16, 128>}, {pipeline_mode = #tpu.pipeline_mode<synchronous>, transform_indices = @transform_1, window_bounds = array<i64: 128, 128>}, {pipeline_mode = #tpu.pipeline_mode<synchronous>, transform_indices = @transform_2, window_bounds = array<i64: 1, 128>}, {pipeline_mode = #tpu.pipeline_mode<synchronous>, transform_indices = @transform_3, window_bounds = array<i64: 128, 256>}, {transform_indices = @transform_4, window_bounds = array<i64: 16, 256>}, {transform_indices = @transform_5, window_bounds = array<i64: 1, 1, 256>}, {transform_indices = @transform_6, window_bounds = array<i64: 1, 1, 256>}]} {
    %c0 = arith.constant 0 : index
    %c0_0 = arith.constant 0 : index
    %0 = vector.load %arg1[%c0, %c0_0] : memref<16x128xbf16, #tpu.memory_space<vmem>>, vector<16x128xbf16>
    %c0_1 = arith.constant 0 : index
    %c0_2 = arith.constant 0 : index
    %1 = vector.load %arg2[%c0_1, %c0_2] : memref<128x128xbf16, #tpu.memory_space<vmem>>, vector<128x128xbf16>
    %cst = arith.constant dense<0.000000e+00> : vector<16x128xf32>
    %2 = tpu.matmul %0, %1, %cst {dimension_numbers = #tpu.dot_dimension_numbers<[1], [0], [0], [1], [0, 0, 1, 1], [], []>} : vector<16x128xbf16>, vector<128x128xbf16>, vector<16x128xf32> -> vector<16x128xf32>
    %c0_3 = arith.constant 0 : index
    %c0_4 = arith.constant 0 : index
    %3 = vector.load %arg3[%c0_3, %c0_4] : memref<1x128xf32, #tpu.memory_space<vmem>>, vector<1x128xf32>
    %4 = vector.broadcast %3 : vector<1x128xf32> to vector<16x128xf32>
    %5 = arith.addf %2, %4 : vector<16x128xf32>
    %cst_5 = arith.constant 2.000000e-01 : f32
    %6 = vector.broadcast %cst_5 : f32 to vector<16x128xf32>
    %7 = arith.mulf %6, %5 : vector<16x128xf32>
    %8 = arith.maximumf %5, %7 : vector<16x128xf32>
    %9 = arith.truncf %8 : vector<16x128xf32> to vector<16x128xbf16>
    %c0_6 = arith.constant 0 : index
    %c0_7 = arith.constant 0 : index
    %10 = vector.load %arg4[%c0_6, %c0_7] : memref<128x256xbf16, #tpu.memory_space<vmem>>, vector<128x256xbf16>
    %cst_8 = arith.constant dense<0.000000e+00> : vector<16x256xf32>
    %11 = tpu.matmul %9, %10, %cst_8 {dimension_numbers = #tpu.dot_dimension_numbers<[1], [0], [0], [1], [0, 0, 1, 1], [], []>} : vector<16x128xbf16>, vector<128x256xbf16>, vector<16x256xf32> -> vector<16x256xf32>
    %12 = arith.truncf %11 : vector<16x256xf32> to vector<16x256xbf16>
    %c0_9 = arith.constant 0 : index
    %c0_10 = arith.constant 0 : index
    %13 = vector.load %arg5[%c0_9, %c0_10] : memref<16x256xbf16, #tpu.memory_space<vmem>>, vector<16x256xbf16>
    tpu.vector_store %arg5[%c0_9, %c0_10], %12 {strides = array<i32>} : memref<16x256xbf16, #tpu.memory_space<vmem>>, vector<16x256xbf16>,
    %14 = arith.extf %12 : vector<16x256xbf16> to vector<16x256xf32>
    %cst_11 = arith.constant dense<0.000000e+00> : vector<256xf32>
    %15 = vector.multi_reduction <add>, %14, %cst_11 [0] : vector<16x256xf32> to vector<256xf32>
    %16 = vector.shape_cast %15 : vector<256xf32> to vector<1x256xf32>
    %17 = vector.shape_cast %16 : vector<1x256xf32> to vector<1x1x256xf32>
    %c0_12 = arith.constant 0 : index
    %c0_13 = arith.constant 0 : index
    %c0_14 = arith.constant 0 : index
    %18 = vector.load %arg6[%c0_12, %c0_13, %c0_14] : memref<1x1x256xf32, #tpu.memory_space<vmem>>, vector<1x1x256xf32>
    tpu.vector_store %arg6[%c0_12, %c0_13, %c0_14], %17 {strides = array<i32>} : memref<1x1x256xf32, #tpu.memory_space<vmem>>, vector<1x1x256xf32>,
    %19 = arith.mulf %14, %14 : vector<16x256xf32>
    %cst_15 = arith.constant dense<0.000000e+00> : vector<256xf32>
    %20 = vector.multi_reduction <add>, %19, %cst_15 [0] : vector<16x256xf32> to vector<256xf32>
    %21 = vector.shape_cast %20 : vector<256xf32> to vector<1x256xf32>
    %22 = vector.shape_cast %21 : vector<1x256xf32> to vector<1x1x256xf32>
    %c0_16 = arith.constant 0 : index
    %c0_17 = arith.constant 0 : index
    %c0_18 = arith.constant 0 : index
    %23 = vector.load %arg7[%c0_16, %c0_17, %c0_18] : memref<1x1x256xf32, #tpu.memory_space<vmem>>, vector<1x1x256xf32>
    tpu.vector_store %arg7[%c0_16, %c0_17, %c0_18], %22 {strides = array<i32>} : memref<1x1x256xf32, #tpu.memory_space<vmem>>, vector<1x1x256xf32>,
    return
  }
  func.func @transform_0(%arg0: i32) -> (i32, i32) {
    %c0_i32 = arith.constant 0 : i32
    %c0_i32_0 = arith.constant 0 : i32
    return %arg0, %c0_i32 : i32, i32
  }
  func.func @transform_1(%arg0: i32) -> (i32, i32) {
    %c0_i32 = arith.constant 0 : i32
    %c0_i32_0 = arith.constant 0 : i32
    %c0_i32_1 = arith.constant 0 : i32
    return %c0_i32, %c0_i32_0 : i32, i32
  }
  func.func @transform_2(%arg0: i32) -> (i32, i32) {
    %c0_i32 = arith.constant 0 : i32
    %c0_i32_0 = arith.constant 0 : i32
    %c0_i32_1 = arith.constant 0 : i32
    return %c0_i32, %c0_i32_0 : i32, i32
  }
  func.func @transform_3(%arg0: i32) -> (i32, i32) {
    %c0_i32 = arith.constant 0 : i32
    %c0_i32_0 = arith.constant 0 : i32
    %c0_i32_1 = arith.constant 0 : i32
    return %c0_i32, %c0_i32_0 : i32, i32
  }
  func.func @transform_4(%arg0: i32) -> (i32, i32) {
    %c0_i32 = arith.constant 0 : i32
    %c0_i32_0 = arith.constant 0 : i32
    return %arg0, %c0_i32 : i32, i32
  }
  func.func @transform_5(%arg0: i32) -> (i32, i32, i32) {
    %c0_i32 = arith.constant 0 : i32
    %c0_i32_0 = arith.constant 0 : i32
    %c0_i32_1 = arith.constant 0 : i32
    return %arg0, %c0_i32, %c0_i32_0 : i32, i32, i32
  }
  func.func @transform_6(%arg0: i32) -> (i32, i32, i32) {
    %c0_i32 = arith.constant 0 : i32
    %c0_i32_0 = arith.constant 0 : i32
    %c0_i32_1 = arith.constant 0 : i32
    return %arg0, %c0_i32, %c0_i32_0 : i32, i32, i32
  }
}

</mosaic_0001>

<bundles_post_ra>
// kernel: tpu_custom_call.1
= control target key start
LH: loop header
LB: loop body
LE: loop exit
PB: predicated region body
PF: predicated region fallthrough
CT: control target
= control target key end

     0   :  { %12 = vsyncpa [#allocation3], 0  ;;  %s783_s0 = inlined_call_operand.hbm [shape: bf16[16,128], index: 0, kind: input, shape index: {}]   ;;  %s784_s1 = inlined_call_operand.hbm [shape: bf16[128,128], index: 1, kind: input, shape index: {}]   ;;  %s785_s2 = inlined_call_operand.vmem [shape: f32[1,128], index: 2, kind: input, shape index: {}]   ;;  %s786_s3 = inlined_call_operand.hbm [shape: bf16[128,256], index: 3, kind: input, shape index: {}]   ;;  %s787_s4 = inlined_call_operand.hbm [shape: bf16[16,256], index: 4, kind: output, shape index: {0}]   ;;  %s788_s5 = inlined_call_operand.hbm [shape: f32[1,1,256], index: 5, kind: output, shape index: {1}]   ;;  %s789_s6 = inlined_call_operand.hbm [shape: f32[1,1,256], index: 6, kind: output, shape index: {2}]  }
   0x1   :  { %13 = vsyncpa [#allocation6], 0 }
   0x2   :  { %14 = vsyncpa [#allocation4], 0 }
   0x3   :  { %15 = vsyncpa [#allocation10], 0  ;;  %s699_s21 = smov [#allocation5]   ;;  %s700_s23 = smov [#allocation2]  }
   0x4   :  { %s33_s22 = sshll.u32 %s699_s21, 4  ;;  %s21_s24 = sshll.u32 %s700_s23, 4  ;;  %s34_s22 = int_to_ptr.vmem [resolvable:$true] %s33_s22  ;;  %s22_s24 = int_to_ptr.vmem [resolvable:$true] %s21_s24 }
   0x5   :  { %s579_s25 = scalar_lea.vmem %s34_s22, 1024  ;;  %p584_p1 = scmp.lt.s32.totalorder %s34_s22, %s34_s22 }
   0x6   :  { %p580_p0 = scmp.ne.s32.totalorder %s34_s22, %s579_s25  ;;  %p585_p2 = scmp.lt.s32.totalorder %s579_s25, %s579_s25 }
   0x8   :  { %p586_p3 = por %p585_p2, %p584_p1 }
   0xa   :  { %p587_p4 = pnand %p586_p3, %p580_p0 }
   0xc   :  { %590 = shalt.err (!%p587_p4)
}
   0xd   :  { %s701_s26 = smov 64   ;;  %s702_s27 = smov 4  }
   0xe   :  { %39 = dma.hbm_to_vmem [thread:$0]  %s784_s1, 1024, %s34_s22, [#allocation6], %s701_s26, %s701_s26, %s702_s27  }
   0xf   :  { %s599_s30 = scalar_lea.vmem %s22_s24, 128  ;;  %p604_p6 = scmp.lt.s32.totalorder %s22_s24, %s22_s24 }
  0x10   :  { %p600_p5 = scmp.ne.s32.totalorder %s22_s24, %s599_s30  ;;  %p605_p7 = scmp.lt.s32.totalorder %s599_s30, %s599_s30 }
  0x12   :  { %p606_p8 = por %p605_p7, %p604_p6 }
  0x14   :  { %p607_p9 = pnand %p606_p8, %p600_p5 }
  0x16   :  { %610 = shalt.err (!%p607_p9)
}
  0x17   :  { %27 = dma.hbm_to_vmem [thread:$0]  %s783_s0, 128, %s22_s24, [#allocation3], %s701_s26, %s701_s26, %s702_s27  }
  0x18   :  { %s703_s9 = smov [#allocation7]  }
  0x19   :  { %s47_s10 = sshll.u32 %s703_s9, 4  ;;  %s48_s10 = int_to_ptr.vmem [resolvable:$true] %s47_s10 }
  0x1a   :  { %s619_s11 = scalar_lea.vmem %s48_s10, 2048  ;;  %p624_p11 = scmp.lt.s32.totalorder %s48_s10, %s48_s10 }
  0x1b   :  { %p620_p10 = scmp.ne.s32.totalorder %s48_s10, %s619_s11  ;;  %p625_p12 = scmp.lt.s32.totalorder %s619_s11, %s619_s11 }
  0x1d   :  { %p626_p13 = por %p625_p12, %p624_p11 }
  0x1f   :  { %p627_p0 = pnand %p626_p13, %p620_p10 }
  0x21   :  { %630 = shalt.err (!%p627_p0)
}
  0x22   :  { %s704_s1 = smov 128   ;;  %s705_s12 = smov 8  }
  0x23   :  { %53 = dma.hbm_to_vmem [thread:$0]  %s786_s3, 2048, %s48_s10, [#allocation6], %s704_s1, %s704_s1, %s705_s12  }
  0x24   :  { %691 = dma.done.wait [#allocation3], 128  }
  0x25   :  { %692 = vsyncadd [#allocation3], 4294967168 }
  0x26   :  { %693 = dma.done.wait [#allocation6], 3072  }
  0x27   :  { %694 = vsyncadd [#allocation6], 4294964224  ;;  %v706_v0 = vmov 0.0   ;;  %vm707_vm0 = vmmov 0   ;;  %v538_v1 = vld [vmem:[#allocation5 + $0x38] sm:$0xff]   ;;  %v539_v2 = vld [vmem:[#allocation5 + $0x30] sm:$0xff]  }
  0x28   :  { %504 = vmatprep.subr.bf16.mxu0 %v706_v0  ;;  %520 = vmatprep.mubr.msk.bf16.mxu0 %vm707_vm0, %v706_v0  ;;  %v540_v3 = vld [vmem:[#allocation5 + $0x28] sm:$0xff]   ;;  %v541_v4 = vld [vmem:[#allocation5 + $0x20] sm:$0xff]   ;;  %v547_v5 = vld [vmem:[#allocation7 + $0x74] ss:$8 sps:$4 sm:$0xff]   ;;  %v708_v26 = vmov 0   ;;  %s709_s15 = smov [#allocation8]  }
  0x29   :  { %505 = vmatpush3.bf16.msra.mxu0 %v538_v1  ;;  %v549_v6 = vld [vmem:[#allocation7 + $0x70] ss:$8 sps:$4 sm:$0xff]   ;;  %285 = vmatprep.subr.bf16.mxu1 %v547_v5  ;;  %v550_v7 = vld [vmem:[#allocation7 + $0x64] ss:$8 sps:$4 sm:$0xff]   ;;  %v552_v8 = vld [vmem:[#allocation7 + $0x60] ss:$8 sps:$4 sm:$0xff]  }
  0x2a   :  { %506 = vmatprep.subr.bf16.mxu0 %v706_v0  ;;  %286 = vmatpush1.bf16.msra.mxu1 %v549_v6  ;;  %v553_v9 = vld [vmem:[#allocation7 + $0x54] ss:$8 sps:$4 sm:$0xff]   ;;  %v555_v11 = vld [vmem:[#allocation7 + $0x50] ss:$8 sps:$4 sm:$0xff]   ;;  %v556_v12 = vld [vmem:[#allocation7 + $0x44] ss:$8 sps:$4 sm:$0xff]  }
  0x2b   :  { %287 = vmatprep.subr.bf16.mxu1 %v550_v7  ;;  %v542_v10 = vld [vmem:[#allocation5 + $0x18] sm:$0xff]   ;;  %v543_v13 = vld [vmem:[#allocation5 + $0x10] sm:$0xff]   ;;  %v558_v14 = vld [vmem:[#allocation7 + $0x40] ss:$8 sps:$4 sm:$0xff]   ;;  %317 = vmatprep.mubr.bf16.mxu1 %v708_v26  ;;  %s425_s16 = sshll.u32 %s709_s15, 4  ;;  %s426_s16 = int_to_ptr.vmem [resolvable:$true] %s425_s16 }
  0x2c   :  { %v559_v15 = vld [vmem:[#allocation7 + $0x34] ss:$8 sps:$4 sm:$0xff]   ;;  %v544_v16 = vld [vmem:[#allocation5 + $0x8] sm:$0xff]   ;;  %v561_v17 = vld [vmem:[#allocation7 + $0x30] ss:$8 sps:$4 sm:$0xff]   ;;  %p636_p2 = scmp.lt.s32.totalorder %s426_s16, %s426_s16 }
  0x2d   :  { %507 = vmatpush3.bf16.msra.mxu0 %v539_v2  ;;  %v545_v18 = vld [vmem:[#allocation5] sm:$0xff]   ;;  %v546_v19 = vld [vmem:[#allocation2] sm:$0xff]  }
  0x2e   :  { %508 = vmatprep.subr.bf16.mxu0 %v706_v0  ;;  %288 = vmatpush1.bf16.msra.mxu1 %v552_v8  ;;  %v562_v20 = vld [vmem:[#allocation7 + $0x24] ss:$8 sps:$4 sm:$0xff]   ;;  %v564_v21 = vld [vmem:[#allocation7 + $0x20] ss:$8 sps:$4 sm:$0xff]   ;;  %v565_v22 = vld [vmem:[#allocation7 + $0x14] ss:$8 sps:$4 sm:$0xff]  }
  0x2f   :  { %289 = vmatprep.subr.bf16.mxu1 %v553_v9  ;;  %v567_v23 = vld [vmem:[#allocation7 + $0x10] ss:$8 sps:$4 sm:$0xff]   ;;  %v568_v24 = vld [vmem:[#allocation7 + $0x4] ss:$8 sps:$4 sm:$0xff]   ;;  %v570_v25 = vld [vmem:[#allocation7] ss:$8 sps:$4 sm:$0xff]  }
  0x30   :  { %v465_v27 = vld [vmem:[%s785_s2] ss:$0 sm:$0xff]  ;;  %s631_s2 = scalar_lea.vmem %s426_s16, 256 }
  0x31   :  { %509 = vmatpush3.bf16.msra.mxu0 %v540_v3  ;;  %p632_p1 = scmp.ne.s32.totalorder %s426_s16, %s631_s2  ;;  %p637_p3 = scmp.lt.s32.totalorder %s631_s2, %s631_s2 }
  0x32   :  { %510 = vmatprep.subr.bf16.mxu0 %v706_v0  ;;  %290 = vmatpush1.bf16.msra.mxu1 %v555_v11 }
  0x33   :  { %291 = vmatprep.subr.bf16.mxu1 %v556_v12  ;;  %p638_p4 = por %p637_p3, %p636_p2 }
  0x35   :  { %511 = vmatpush3.bf16.msra.mxu0 %v541_v4  ;;  %p639_p5 = pnand %p638_p4, %p632_p1 }
  0x36   :  { %512 = vmatprep.subr.bf16.mxu0 %v706_v0  ;;  %292 = vmatpush1.bf16.msra.mxu1 %v558_v14 }
  0x37   :  { %293 = vmatprep.subr.bf16.mxu1 %v559_v15 }
  0x39   :  { %513 = vmatpush3.bf16.msra.mxu0 %v542_v10 }
  0x3a   :  { %514 = vmatprep.subr.bf16.mxu0 %v706_v0  ;;  %294 = vmatpush1.bf16.msra.mxu1 %v561_v17 }
  0x3b   :  { %295 = vmatprep.subr.bf16.mxu1 %v562_v20 }
  0x3d   :  { %515 = vmatpush3.bf16.msra.mxu0 %v543_v13 }
  0x3e   :  { %516 = vmatprep.subr.bf16.mxu0 %v706_v0  ;;  %296 = vmatpush1.bf16.msra.mxu1 %v564_v21 }
  0x3f   :  { %297 = vmatprep.subr.bf16.mxu1 %v565_v22 }
  0x41   :  { %517 = vmatpush3.bf16.msra.mxu0 %v544_v16 }
  0x42   :  { %518 = vmatprep.subr.bf16.mxu0 %v706_v0  ;;  %298 = vmatpush1.bf16.msra.mxu1 %v567_v23 }
  0x43   :  { %299 = vmatprep.subr.bf16.mxu1 %v568_v24 }
  0x45   :  { %519 = vmatpush3.bf16.msra.mxu0 %v545_v18 }
  0x46   :  { %300 = vmatpush1.bf16.msra.mxu1 %v570_v25 }
  0x48   :  { %521 = vmatmul.mubr.bf16.vlgmr.msra.gmra.mxu0 %v546_v19 }
 0x108   :  { %v177_v28 = vpop.f32.mrf.mxu0 }
 0x109   :  { %v178_v29 = vadd.f32 %v465_v27, %v177_v28 }
 0x10a   :  { %v522_v30 = vpop.f32.mrf.mxu0 }
 0x10b   :  { %v184_v32 = vmul.f32 0.2, %v178_v29 }
 0x10c   :  { %v180_v31 = vpop.f32.mrf.mxu0 }
 0x10d   :  { %v181_v33 = vadd.f32 %v465_v27, %v180_v31  ;;  %v186_v36 = vmax.f32 %v178_v29, %v184_v32 }
 0x10e   :  { %v523_v34 = vpop.f32.mrf.mxu0 }
 0x10f   :  { %v185_v35 = vmul.f32 0.2, %v181_v33 }
 0x111   :  { %v187_v37 = vmax.f32 %v181_v33, %v185_v35 }
 0x113   :  { %v188_v38 = vpack.c.bf16 %v187_v37, %v186_v36 }
 0x115   :  { %318 = vmatmul.mubr.bf16.vlgmr.msra.gmra.mxu1 %v188_v38 }
 0x1d5   :  { %v319_v39 = vpop.f32.mrf.mxu1 }
 0x1d7   :  { %v321_v40 = vpop.f32.mrf.mxu1 }
 0x1d8   :  { %v493_v41 = vpack.c.bf16 %v321_v40, %v319_v39 }
 0x1d9   :  { %v323_v42 = vpop.f32.mrf.mxu1 }
 0x1da   :  { %340 = vst [vmem:[#allocation8] sm:$0xff] %v493_v41  ;;  %v328_v43 = vpack.c.bf16 %v323_v42, %v319_v39 }
 0x1db   :  { %v325_v44 = vpop.f32.mrf.mxu1 }
 0x1dc   :  { %v342_v45 = vunpack.c.l.bf16 %v328_v43  ;;  %v344_v46 = vunpack.c.h.bf16 %v328_v43  ;;  %v329_v47 = vpack.c.bf16 %v325_v44, %v321_v40  ;;  %v494_v48 = vpack.c.bf16 %v325_v44, %v323_v42 }
 0x1de   :  { %v346_v49 = vadd.f32 %v344_v46, %v342_v45  ;;  %v383_v50 = vmul.f32 %v342_v45, %v342_v45  ;;  %v385_v51 = vmul.f32 %v344_v46, %v344_v46  ;;  %341 = vst [vmem:[#allocation8 + $0x8] sm:$0xff] %v494_v48  ;;  %v343_v52 = vunpack.c.l.bf16 %v329_v47 }
 0x1df   :  { %v345_v53 = vunpack.c.h.bf16 %v329_v47 }
 0x1e0   :  { %642 = shalt.err (!%p639_p5)
}
 0x1e1   :  { %431 = dma.vmem_to_hbm [thread:$0]  %s426_s16, 256, %s787_s4, [#allocation4], %s704_s1, %s704_s1, %s705_s12   ;;  %v347_v54 = vrot.slane %v346_v49, 4  ;;  %v387_v55 = vadd.f32 %v385_v51, %v383_v50  ;;  %v384_v56 = vmul.f32 %v343_v52, %v343_v52  ;;  %v353_v57 = vadd.f32 %v345_v53, %v343_v52 }
 0x1e2   :  { %v386_v58 = vmul.f32 %v345_v53, %v345_v53  ;;  %v710_v1 = vmov 1966171168   ;;  %v366_v5 = vlaneseq  ;;  %s711_s4 = smov [#allocation9]   ;;  %s712_s20 = smov [#allocation11]  }
 0x1e3   :  { %v348_v59 = vadd.f32 %v347_v54, %v346_v49  ;;  %v388_v60 = vrot.slane %v387_v55, 4  ;;  %v354_v61 = vrot.slane %v353_v57, 4  ;;  %v364_v2 = vunpack.c.l.s4 %v710_v1  ;;  %s438_s19 = sshll.u32 %s711_s4, 4  ;;  %s448_s21 = sshll.u32 %s712_s20, 4  ;;  %s439_s19 = int_to_ptr.vmem [resolvable:$true] %s438_s19  ;;  %s449_s21 = int_to_ptr.vmem [resolvable:$true] %s448_s21 }
 0x1e4   :  { %v394_v62 = vadd.f32 %v386_v58, %v384_v56  ;;  %v367_v15 = vshrl.u32 %v366_v5, 7  ;;  %vm769_vm1 = vcmp.lt.s32.totalorder %v366_v5, 256  ;;  %s651_s22 = scalar_lea.vmem %s439_s19, 32  ;;  %p656_p7 = scmp.lt.s32.totalorder %s439_s19, %s439_s19 }
 0x1e5   :  { %v349_v63 = vrot.slane %v348_v59, 2  ;;  %v389_v0 = vadd.f32 %v388_v60, %v387_v55  ;;  %v355_v3 = vadd.f32 %v354_v61, %v353_v57  ;;  %v365_v11 = vunpack.c.0.s8 %v364_v2  ;;  %p652_p6 = scmp.ne.s32.totalorder %s439_s19, %s651_s22  ;;  %p657_p8 = scmp.lt.s32.totalorder %s651_s22, %s651_s22 }
 0x1e6   :  { %v395_v4 = vrot.slane %v394_v62, 4 }
 0x1e7   :  { %v350_v6 = vadd.f32 %v349_v63, %v348_v59  ;;  %v390_v7 = vrot.slane %v389_v0, 2  ;;  %v356_v8 = vrot.slane %v355_v3, 2  ;;  %v368_v22 = vsub.s32 %v365_v11, %v367_v15  ;;  %p658_p9 = por %p657_p8, %p656_p7 }
 0x1e8   :  { %v396_v9 = vadd.f32 %v395_v4, %v394_v62 }
 0x1e9   :  { %v391_v10 = vadd.f32 %v390_v7, %v389_v0  ;;  %v351_v12 = vrot.slane %v350_v6, 1  ;;  %v357_v13 = vadd.f32 %v356_v8, %v355_v3  ;;  %p659_p10 = pnand %p658_p9, %p652_p6 }
 0x1ea   :  { %v397_v14 = vrot.slane %v396_v9, 2 }
 0x1eb   :  { %v392_v16 = vrot.slane %v391_v10, 1  ;;  %v358_v17 = vrot.slane %v357_v13, 1  ;;  %v352_v19 = vadd.f32 %v351_v12, %v350_v6 }
 0x1ec   :  { %v398_v18 = vadd.f32 %v397_v14, %v396_v9 }
 0x1ed   :  { %v359_v20 = vadd.f32 %v358_v17, %v357_v13  ;;  %v393_v23 = vadd.f32 %v392_v16, %v391_v10 }
 0x1ee   :  { %v399_v21 = vrot.slane %v398_v18, 1 }
 0x1ef   :  { %v362_v25 = vcombine.low %v352_v19, %v359_v20 }
 0x1f0   :  { %v400_v24 = vadd.f32 %v399_v21, %v398_v18 }
 0x1f1   :  { %v369_v26 = vrot.slane %v362_v25, %v368_v22 }
 0x1f2   :  { %v403_v27 = vcombine.low %v393_v23, %v400_v24 }
 0x1f3   :  { %v376_v29 = vrot.slane %v369_v26, %v368_v22 }
 0x1f4   :  { %v410_v30 = vrot.slane %v403_v27, %v368_v22 }
 0x1f5   :  { %382 = vst.msk [vmem:[#allocation9] sm:$0x3] %vm769_vm1, %v376_v29 }
 0x1f6   :  { %v417_v31 = vrot.slane %v410_v30, %v368_v22 }
 0x1f7   :  { %662 = shalt.err (!%p659_p10)
}
 0x1f8   :  { %441 = dma.vmem_to_hbm [thread:$0]  %s439_s19, 32, %s788_s5, [#allocation10]   ;;  %419 = vst.msk [vmem:[#allocation11] sm:$0x3] %vm769_vm1, %v417_v31 }
 0x1f9   :  { %s671_s25 = scalar_lea.vmem %s449_s21, 32  ;;  %p676_p12 = scmp.lt.s32.totalorder %s449_s21, %s449_s21 }
 0x1fa   :  { %p672_p11 = scmp.ne.s32.totalorder %s449_s21, %s671_s25  ;;  %p677_p13 = scmp.lt.s32.totalorder %s671_s25, %s671_s25 }
 0x1fc   :  { %p678_p0 = por %p677_p13, %p676_p12 }
 0x1fe   :  { %p679_p1 = pnand %p678_p0, %p672_p11 }
 0x200   :  { %682 = shalt.err (!%p679_p1)
}
 0x201   :  { %451 = dma.vmem_to_hbm [thread:$0]  %s449_s21, 32, %s789_s6, [#allocation10]  }
 0x202   :  { %695 = dma.done.wait [#allocation4], 256  }
 0x203   :  { %696 = vsyncadd [#allocation4], 4294967040 }
 0x204   :  { %697 = dma.done.wait [#allocation10], 64  }
 0x205   :  { %698 = vsyncadd [#allocation10], 4294967232 }
 0x206   :  { %461 = vsyncpa [#allocation3], 1 }
 0x207   :  { %462 = vsyncpa [#allocation6], 1 }
 0x208   :  { %463 = vsyncpa [#allocation4], 1 }
 0x209   :  { %464 = vsyncpa [#allocation10], 1 }

</bundles_post_ra>
